<compile_context>
chip_gen: v5e
topology: v5e:2x2
jax: 0.10.0
libtpu: 0.0.40
codegen_flags: <defaults>
</compile_context>

<pallas_src>
import math

import jax
import jax.numpy as jnp
from jax.experimental import pallas as pl
from jax.experimental.pallas import tpu as pltpu


def _spectral_mul_kernel(xr_ref, xi_ref, wr_ref, wi_ref, or_ref, oi_ref):
    """One batch element per grid step.

    xr/xi: (1, C_in, NF)        real/imag of x_ft (zero beyond the kept modes)
    wr/wi: (C_in, C_out, NF)    real/imag of weights (zero beyond the kept modes)
    or/oi: (1, C_out, NF)       real/imag of out_ft (padding region is exactly 0)
    """
    c_in = wr_ref.shape[0]

    xr = xr_ref[0]                      # (C_in, NF)
    xi = xi_ref[0]

    acc_r = jnp.zeros(or_ref.shape[1:], jnp.float32)   # (C_out, NF)
    acc_i = jnp.zeros(oi_ref.shape[1:], jnp.float32)

    # Unrolled C_in reduction; each step is a lane-dense (C_out, NF) VPU
    # multiply-add.  C_in is a static, small channel count, so the full unroll
    # keeps the live set tiny while giving the LLO scheduler full visibility.
    for i in range(c_in):
        xr_i = xr[i:i + 1, :]           # (1, NF) -> sublane-broadcast over C_out
        xi_i = xi[i:i + 1, :]
        wr_i = wr_ref[i]                # (C_out, NF)
        wi_i = wi_ref[i]
        acc_r = acc_r + xr_i * wr_i - xi_i * wi_i
        acc_i = acc_i + xr_i * wi_i + xi_i * wr_i

    # Single full-width, unmasked store per output (pad lanes are exact zeros
    # because the inputs are zero-padded).
    or_ref[0] = acc_r
    oi_ref[0] = acc_i


def spectral_compl_mul1d_padded(xr, xi, wr, wi):
    """Pallas call: einsum('bix,iox->box') on complex data split into re/im.

    xr, xi: f32 (B, C_in, n_freq)     (frequencies beyond `modes` are zero)
    wr, wi: f32 (C_in, C_out, n_freq) (frequencies beyond `modes` are zero)
    returns: (out_r, out_i) f32 (B, C_out, n_freq)
    """
    B, C_in, NF = xr.shape
    _, C_out, _ = wr.shape

    grid = (B,)
    in_specs = [
        pl.BlockSpec((1, C_in, NF), lambda b: (b, 0, 0)),
        pl.BlockSpec((1, C_in, NF), lambda b: (b, 0, 0)),
        pl.BlockSpec((C_in, C_out, NF), lambda b: (0, 0, 0)),  # weights resident
        pl.BlockSpec((C_in, C_out, NF), lambda b: (0, 0, 0)),
    ]
    out_specs = [
        pl.BlockSpec((1, C_out, NF), lambda b: (b, 0, 0)),
        pl.BlockSpec((1, C_out, NF), lambda b: (b, 0, 0)),
    ]
    out_shape = [
        jax.ShapeDtypeStruct((B, C_out, NF), jnp.float32),
        jax.ShapeDtypeStruct((B, C_out, NF), jnp.float32),
    ]

    out_r, out_i = pl.pallas_call(
        _spectral_mul_kernel,
        grid_spec=pltpu.PrefetchScalarGridSpec(
            num_scalar_prefetch=0,
            grid=grid,
            in_specs=in_specs,
            out_specs=out_specs,
        ),
        out_shape=out_shape,
        compiler_params=pltpu.CompilerParams(
            dimension_semantics=("parallel",)),
    )(xr, xi, wr, wi)
    return out_r, out_i


def spectral_conv1d_forward(x, weights, modes):
    """Forward pass matching PyTorch SpectralConv1d.forward.

    x:       float32 (B, C_in, N)
    weights: complex64 (C_in, C_out, modes)
    returns: float32 (B, C_out, 2 * (N//2 + 1 - 1))   (== N for even N, as in torch)
    """
    B, C_in, N = x.shape
    C_out = weights.shape[1]
    n_freq = N // 2 + 1
    m = min(modes, n_freq)
    pad = n_freq - m

    # TODO(synk): rfft/irfft have no Pallas TPU primitive; done in plain JAX.
    x_ft = jnp.fft.rfft(x)                                  # (B, C_in, n_freq) complex64

    # Split into re/im and zero-pad the frequency axis up to n_freq.  The pad
    # fuses with the slice/real/imag extraction under jit and lets the kernel
    # emit the full-width out_ft directly (no zeros+scatter pass).
    xm = x_ft[:, :, :m]
    wm = weights[:, :, :m]
    fpad = ((0, 0), (0, 0), (0, pad))
    xr = jnp.pad(jnp.real(xm).astype(jnp.float32), fpad)
    xi = jnp.pad(jnp.imag(xm).astype(jnp.float32), fpad)
    wr = jnp.pad(jnp.real(wm).astype(jnp.float32), fpad)
    wi = jnp.pad(jnp.imag(wm).astype(jnp.float32), fpad)

    out_r, out_i = spectral_compl_mul1d_padded(xr, xi, wr, wi)

    out_ft = jax.lax.complex(out_r, out_i)                  # (B, C_out, n_freq)
    out = jnp.fft.irfft(out_ft)                             # default n = 2*(n_freq-1), as torch
    return out.astype(jnp.float32)


def init_weights(key, in_channels, out_channels, modes):
    """Deterministic xavier_normal-style init for complex weights."""
    fan_sum = (in_channels + out_channels) * modes
    std = 1.0 * math.sqrt(2.0 / fan_sum)
    kr, ki = jax.random.split(key)
    wr = jax.random.normal(kr, (in_channels, out_channels, modes), jnp.float32) * std
    wi = jax.random.normal(ki, (in_channels, out_channels, modes), jnp.float32) * std
    return (wr + 1j * wi).astype(jnp.complex64)


if __name__ == "__main__":
    B, C_in, C_out, N, modes = 2, 4, 4, 16, 8

    key = jax.random.PRNGKey(0)
    kx, kw = jax.random.split(key)
    x = jax.random.normal(kx, (B, C_in, N), jnp.float32)
    weights = init_weights(kw, C_in, C_out, modes)

    fwd = jax.jit(spectral_conv1d_forward, static_argnums=2)
    out = fwd(x, weights, modes)
    out = jax.block_until_ready(out)

    # sanity check against a plain-JAX reference of the same math
    x_ft = jnp.fft.rfft(x)
    ref_modes = jnp.einsum('bix,iox->box', x_ft[:, :, :modes], weights)
    ref_ft = jnp.zeros((B, C_out, N // 2 + 1), jnp.complex64).at[:, :, :modes].set(ref_modes)
    ref = jnp.fft.irfft(ref_ft).astype(jnp.float32)
    assert out.shape == ref.shape == (B, C_out, N)
    assert jnp.allclose(out, ref, atol=1e-4, rtol=1e-4)

    print("KERNEL_OK")
</pallas_src>

<mosaic_0001>
module attributes {stable_mosaic.version = 11 : i64} {
  func.func @_spectral_mul_kernel(%arg0: i32, %arg1: memref<1x4x9xf32, #tpu.memory_space<vmem>>, %arg2: memref<1x4x9xf32, #tpu.memory_space<vmem>>, %arg3: memref<4x4x9xf32, #tpu.memory_space<vmem>>, %arg4: memref<4x4x9xf32, #tpu.memory_space<vmem>>, %arg5: memref<1x4x9xf32, #tpu.memory_space<vmem>>, %arg6: memref<1x4x9xf32, #tpu.memory_space<vmem>>) attributes {dimension_semantics = [#tpu.dimension_semantics<parallel>], iteration_bounds = array<i64: 2>, scalar_prefetch = 0 : i64, scratch_operands = 0 : i64, tpu.core_type = #tpu.core_type<tc>, window_params = [{transform_indices = @transform_0, window_bounds = array<i64: 1, 4, 9>}, {transform_indices = @transform_1, window_bounds = array<i64: 1, 4, 9>}, {pipeline_mode = #tpu.pipeline_mode<synchronous>, transform_indices = @transform_2, window_bounds = array<i64: 4, 4, 9>}, {pipeline_mode = #tpu.pipeline_mode<synchronous>, transform_indices = @transform_3, window_bounds = array<i64: 4, 4, 9>}, {transform_indices = @transform_4, window_bounds = array<i64: 1, 4, 9>}, {transform_indices = @transform_5, window_bounds = array<i64: 1, 4, 9>}]} {
    %c0 = arith.constant 0 : index
    %c0_0 = arith.constant 0 : index
    %c0_1 = arith.constant 0 : index
    %0 = vector.load %arg1[%c0, %c0_0, %c0_1] : memref<1x4x9xf32, #tpu.memory_space<vmem>>, vector<1x4x9xf32>
    %1 = vector.shape_cast %0 : vector<1x4x9xf32> to vector<4x9xf32>
    %c0_2 = arith.constant 0 : index
    %c0_3 = arith.constant 0 : index
    %c0_4 = arith.constant 0 : index
    %2 = vector.load %arg2[%c0_2, %c0_3, %c0_4] : memref<1x4x9xf32, #tpu.memory_space<vmem>>, vector<1x4x9xf32>
    %3 = vector.shape_cast %2 : vector<1x4x9xf32> to vector<4x9xf32>
    %cst = arith.constant 0.000000e+00 : f32
    %4 = vector.broadcast %cst : f32 to vector<4x9xf32>
    %cst_5 = arith.constant 0.000000e+00 : f32
    %5 = vector.broadcast %cst_5 : f32 to vector<4x9xf32>
    %6 = vector.extract_strided_slice %1 {offsets = [0, 0], sizes = [1, 9], strides = [1, 1]} : vector<4x9xf32> to vector<1x9xf32>
    %7 = vector.extract_strided_slice %3 {offsets = [0, 0], sizes = [1, 9], strides = [1, 1]} : vector<4x9xf32> to vector<1x9xf32>
    %c0_6 = arith.constant 0 : index
    %c0_7 = arith.constant 0 : index
    %c0_8 = arith.constant 0 : index
    %8 = vector.load %arg3[%c0_6, %c0_7, %c0_8] : memref<4x4x9xf32, #tpu.memory_space<vmem>>, vector<1x4x9xf32>
    %9 = vector.shape_cast %8 : vector<1x4x9xf32> to vector<4x9xf32>
    %c0_9 = arith.constant 0 : index
    %c0_10 = arith.constant 0 : index
    %c0_11 = arith.constant 0 : index
    %10 = vector.load %arg4[%c0_9, %c0_10, %c0_11] : memref<4x4x9xf32, #tpu.memory_space<vmem>>, vector<1x4x9xf32>
    %11 = vector.shape_cast %10 : vector<1x4x9xf32> to vector<4x9xf32>
    %12 = vector.broadcast %6 : vector<1x9xf32> to vector<4x9xf32>
    %13 = arith.mulf %12, %9 : vector<4x9xf32>
    %14 = arith.addf %4, %13 : vector<4x9xf32>
    %15 = vector.broadcast %7 : vector<1x9xf32> to vector<4x9xf32>
    %16 = arith.mulf %15, %11 : vector<4x9xf32>
    %17 = arith.subf %14, %16 : vector<4x9xf32>
    %18 = vector.broadcast %6 : vector<1x9xf32> to vector<4x9xf32>
    %19 = arith.mulf %18, %11 : vector<4x9xf32>
    %20 = arith.addf %5, %19 : vector<4x9xf32>
    %21 = vector.broadcast %7 : vector<1x9xf32> to vector<4x9xf32>
    %22 = arith.mulf %21, %9 : vector<4x9xf32>
    %23 = arith.addf %20, %22 : vector<4x9xf32>
    %24 = vector.extract_strided_slice %1 {offsets = [1, 0], sizes = [1, 9], strides = [1, 1]} : vector<4x9xf32> to vector<1x9xf32>
    %25 = vector.extract_strided_slice %3 {offsets = [1, 0], sizes = [1, 9], strides = [1, 1]} : vector<4x9xf32> to vector<1x9xf32>
    %c1 = arith.constant 1 : index
    %c0_12 = arith.constant 0 : index
    %c0_13 = arith.constant 0 : index
    %26 = vector.load %arg3[%c1, %c0_12, %c0_13] : memref<4x4x9xf32, #tpu.memory_space<vmem>>, vector<1x4x9xf32>
    %27 = vector.shape_cast %26 : vector<1x4x9xf32> to vector<4x9xf32>
    %c1_14 = arith.constant 1 : index
    %c0_15 = arith.constant 0 : index
    %c0_16 = arith.constant 0 : index
    %28 = vector.load %arg4[%c1_14, %c0_15, %c0_16] : memref<4x4x9xf32, #tpu.memory_space<vmem>>, vector<1x4x9xf32>
    %29 = vector.shape_cast %28 : vector<1x4x9xf32> to vector<4x9xf32>
    %30 = vector.broadcast %24 : vector<1x9xf32> to vector<4x9xf32>
    %31 = arith.mulf %30, %27 : vector<4x9xf32>
    %32 = arith.addf %17, %31 : vector<4x9xf32>
    %33 = vector.broadcast %25 : vector<1x9xf32> to vector<4x9xf32>
    %34 = arith.mulf %33, %29 : vector<4x9xf32>
    %35 = arith.subf %32, %34 : vector<4x9xf32>
    %36 = vector.broadcast %24 : vector<1x9xf32> to vector<4x9xf32>
    %37 = arith.mulf %36, %29 : vector<4x9xf32>
    %38 = arith.addf %23, %37 : vector<4x9xf32>
    %39 = vector.broadcast %25 : vector<1x9xf32> to vector<4x9xf32>
    %40 = arith.mulf %39, %27 : vector<4x9xf32>
    %41 = arith.addf %38, %40 : vector<4x9xf32>
    %42 = vector.extract_strided_slice %1 {offsets = [2, 0], sizes = [1, 9], strides = [1, 1]} : vector<4x9xf32> to vector<1x9xf32>
    %43 = vector.extract_strided_slice %3 {offsets = [2, 0], sizes = [1, 9], strides = [1, 1]} : vector<4x9xf32> to vector<1x9xf32>
    %c2 = arith.constant 2 : index
    %c0_17 = arith.constant 0 : index
    %c0_18 = arith.constant 0 : index
    %44 = vector.load %arg3[%c2, %c0_17, %c0_18] : memref<4x4x9xf32, #tpu.memory_space<vmem>>, vector<1x4x9xf32>
    %45 = vector.shape_cast %44 : vector<1x4x9xf32> to vector<4x9xf32>
    %c2_19 = arith.constant 2 : index
    %c0_20 = arith.constant 0 : index
    %c0_21 = arith.constant 0 : index
    %46 = vector.load %arg4[%c2_19, %c0_20, %c0_21] : memref<4x4x9xf32, #tpu.memory_space<vmem>>, vector<1x4x9xf32>
    %47 = vector.shape_cast %46 : vector<1x4x9xf32> to vector<4x9xf32>
    %48 = vector.broadcast %42 : vector<1x9xf32> to vector<4x9xf32>
    %49 = arith.mulf %48, %45 : vector<4x9xf32>
    %50 = arith.addf %35, %49 : vector<4x9xf32>
    %51 = vector.broadcast %43 : vector<1x9xf32> to vector<4x9xf32>
    %52 = arith.mulf %51, %47 : vector<4x9xf32>
    %53 = arith.subf %50, %52 : vector<4x9xf32>
    %54 = vector.broadcast %42 : vector<1x9xf32> to vector<4x9xf32>
    %55 = arith.mulf %54, %47 : vector<4x9xf32>
    %56 = arith.addf %41, %55 : vector<4x9xf32>
    %57 = vector.broadcast %43 : vector<1x9xf32> to vector<4x9xf32>
    %58 = arith.mulf %57, %45 : vector<4x9xf32>
    %59 = arith.addf %56, %58 : vector<4x9xf32>
    %60 = vector.extract_strided_slice %1 {offsets = [3, 0], sizes = [1, 9], strides = [1, 1]} : vector<4x9xf32> to vector<1x9xf32>
    %61 = vector.extract_strided_slice %3 {offsets = [3, 0], sizes = [1, 9], strides = [1, 1]} : vector<4x9xf32> to vector<1x9xf32>
    %c3 = arith.constant 3 : index
    %c0_22 = arith.constant 0 : index
    %c0_23 = arith.constant 0 : index
    %62 = vector.load %arg3[%c3, %c0_22, %c0_23] : memref<4x4x9xf32, #tpu.memory_space<vmem>>, vector<1x4x9xf32>
    %63 = vector.shape_cast %62 : vector<1x4x9xf32> to vector<4x9xf32>
    %c3_24 = arith.constant 3 : index
    %c0_25 = arith.constant 0 : index
    %c0_26 = arith.constant 0 : index
    %64 = vector.load %arg4[%c3_24, %c0_25, %c0_26] : memref<4x4x9xf32, #tpu.memory_space<vmem>>, vector<1x4x9xf32>
    %65 = vector.shape_cast %64 : vector<1x4x9xf32> to vector<4x9xf32>
    %66 = vector.broadcast %60 : vector<1x9xf32> to vector<4x9xf32>
    %67 = arith.mulf %66, %63 : vector<4x9xf32>
    %68 = arith.addf %53, %67 : vector<4x9xf32>
    %69 = vector.broadcast %61 : vector<1x9xf32> to vector<4x9xf32>
    %70 = arith.mulf %69, %65 : vector<4x9xf32>
    %71 = arith.subf %68, %70 : vector<4x9xf32>
    %72 = vector.broadcast %60 : vector<1x9xf32> to vector<4x9xf32>
    %73 = arith.mulf %72, %65 : vector<4x9xf32>
    %74 = arith.addf %59, %73 : vector<4x9xf32>
    %75 = vector.broadcast %61 : vector<1x9xf32> to vector<4x9xf32>
    %76 = arith.mulf %75, %63 : vector<4x9xf32>
    %77 = arith.addf %74, %76 : vector<4x9xf32>
    %c0_27 = arith.constant 0 : index
    %c0_28 = arith.constant 0 : index
    %c0_29 = arith.constant 0 : index
    %78 = vector.load %arg5[%c0_27, %c0_28, %c0_29] : memref<1x4x9xf32, #tpu.memory_space<vmem>>, vector<1x4x9xf32>
    %79 = vector.shape_cast %78 : vector<1x4x9xf32> to vector<4x9xf32>
    %80 = vector.shape_cast %71 : vector<4x9xf32> to vector<1x4x9xf32>
    tpu.vector_store %arg5[%c0_27, %c0_28, %c0_29], %80 {strides = array<i32>} : memref<1x4x9xf32, #tpu.memory_space<vmem>>, vector<1x4x9xf32>,
    %c0_30 = arith.constant 0 : index
    %c0_31 = arith.constant 0 : index
    %c0_32 = arith.constant 0 : index
    %81 = vector.load %arg6[%c0_30, %c0_31, %c0_32] : memref<1x4x9xf32, #tpu.memory_space<vmem>>, vector<1x4x9xf32>
    %82 = vector.shape_cast %81 : vector<1x4x9xf32> to vector<4x9xf32>
    %83 = vector.shape_cast %77 : vector<4x9xf32> to vector<1x4x9xf32>
    tpu.vector_store %arg6[%c0_30, %c0_31, %c0_32], %83 {strides = array<i32>} : memref<1x4x9xf32, #tpu.memory_space<vmem>>, vector<1x4x9xf32>,
    return
  }
  func.func @transform_0(%arg0: i32) -> (i32, i32, i32) {
    %c0_i32 = arith.constant 0 : i32
    %c0_i32_0 = arith.constant 0 : i32
    %c0_i32_1 = arith.constant 0 : i32
    return %arg0, %c0_i32, %c0_i32_0 : i32, i32, i32
  }
  func.func @transform_1(%arg0: i32) -> (i32, i32, i32) {
    %c0_i32 = arith.constant 0 : i32
    %c0_i32_0 = arith.constant 0 : i32
    %c0_i32_1 = arith.constant 0 : i32
    return %arg0, %c0_i32, %c0_i32_0 : i32, i32, i32
  }
  func.func @transform_2(%arg0: i32) -> (i32, i32, i32) {
    %c0_i32 = arith.constant 0 : i32
    %c0_i32_0 = arith.constant 0 : i32
    %c0_i32_1 = arith.constant 0 : i32
    %c0_i32_2 = arith.constant 0 : i32
    return %c0_i32, %c0_i32_0, %c0_i32_1 : i32, i32, i32
  }
  func.func @transform_3(%arg0: i32) -> (i32, i32, i32) {
    %c0_i32 = arith.constant 0 : i32
    %c0_i32_0 = arith.constant 0 : i32
    %c0_i32_1 = arith.constant 0 : i32
    %c0_i32_2 = arith.constant 0 : i32
    return %c0_i32, %c0_i32_0, %c0_i32_1 : i32, i32, i32
  }
  func.func @transform_4(%arg0: i32) -> (i32, i32, i32) {
    %c0_i32 = arith.constant 0 : i32
    %c0_i32_0 = arith.constant 0 : i32
    %c0_i32_1 = arith.constant 0 : i32
    return %arg0, %c0_i32, %c0_i32_0 : i32, i32, i32
  }
  func.func @transform_5(%arg0: i32) -> (i32, i32, i32) {
    %c0_i32 = arith.constant 0 : i32
    %c0_i32_0 = arith.constant 0 : i32
    %c0_i32_1 = arith.constant 0 : i32
    return %arg0, %c0_i32, %c0_i32_0 : i32, i32, i32
  }
}

</mosaic_0001>

<bundles_post_ra>
// kernel: custom-call.1
= control target key start
LH: loop header
LB: loop body
LE: loop exit
PB: predicated region body
PF: predicated region fallthrough
CT: control target
= control target key end

     0   :  { %s56_s0 = inlined_call_operand.hbm [shape: c64[4,4,8], index: 0, kind: input, shape index: {}]   ;;  %s57_s1 = inlined_call_operand.vmem [shape: f32[4,4,8], index: 1, kind: output, shape index: {}]  }
   0x1   :  { %s2_s8 = scalar_lea.hbm %s56_s0, 16 }
   0x2   :  { %3 = vsyncpa [#allocation0], 0  ;;  %s5_s9 = sshll.u32 %s2_s8, 4  ;;  %s7_s12 = sshll.u32 %s57_s1, 4  ;;  %s6_s9 = int_to_ptr.hbm [resolvable:$true] %s5_s9  ;;  %s8_s12 = int_to_ptr.vmem [resolvable:$true] %s7_s12 }
   0x3   :  { %10 = dma.hbm_to_vmem [thread:$0]  %s6_s9, 256, %s8_s12, [#allocation0] }
   0x4   :  { %38 = dma.done.wait [#allocation0], 256  }
   0x5   :  { %39 = vsyncadd [#allocation0], 4294967040 }
   0x6   :  { %13 = vsyncpa [#allocation0], 1 }

// kernel: custom-call
= control target key start
LH: loop header
LB: loop body
LE: loop exit
PB: predicated region body
PF: predicated region fallthrough
CT: control target
= control target key end

     0   :  { %2 = vsyncpa [#allocation0], 0  ;;  %s55_s0 = inlined_call_operand.hbm [shape: c64[4,4,8], index: 0, kind: input, shape index: {}]   ;;  %s56_s1 = inlined_call_operand.vmem [shape: f32[4,4,8], index: 1, kind: output, shape index: {}]  }
   0x1   :  { %s4_s8 = sshll.u32 %s55_s0, 4  ;;  %s6_s11 = sshll.u32 %s56_s1, 4  ;;  %s5_s8 = int_to_ptr.hbm [resolvable:$true] %s4_s8  ;;  %s7_s11 = int_to_ptr.vmem [resolvable:$true] %s6_s11 }
   0x2   :  { %9 = dma.hbm_to_vmem [thread:$0]  %s5_s8, 256, %s7_s11, [#allocation0] }
   0x3   :  { %37 = dma.done.wait [#allocation0], 256  }
   0x4   :  { %38 = vsyncadd [#allocation0], 4294967040 }
   0x5   :  { %12 = vsyncpa [#allocation0], 1 }

// kernel: reverse.1
= control target key start
LH: loop header
LB: loop body
LE: loop exit
PB: predicated region body
PF: predicated region fallthrough
CT: control target
= control target key end

     0   :  { %v2_v0 = vlaneseq  ;;  %s152_s0 = inlined_call_operand.vmem [shape: f32[2,4,7], index: 0, kind: input, shape index: {}]   ;;  %s153_s1 = inlined_call_operand.vmem [shape: f32[2,4,7], index: 1, kind: output, shape index: {}]  }
   0x2   :  { %v3_v1 = vsub.s32 6, %v2_v0 }
   0x4   :  { %4 = vset.pattern.permute.xlu0 %v3_v1 }
   0x5   :  { %v21_v2 = vld [vmem:[%s152_s0] sm:$0xff]  }
   0x6   :  { %22 = vst [vmem:[#allocation1] sm:$0xff] %v21_v2  }
   0xd   :  { %v56_v3 = vld [vmem:[#allocation1] sm:$0xf]  ;;  %v53_v4 = vld [vmem:[#allocation1 + $0x4] sm:$0xf] }
   0xe   :  { %57 = vst [vmem:[#allocation0] sm:$0xf] %v56_v3 }
   0xf   :  { %55 = vst [vmem:[#allocation0 + $0x8] sm:$0xf] %v53_v4 }
  0x15   :  { %v58_v5 = vld [vmem:[#allocation0] sm:$0xff] }
  0x16   :  { %59 = vperm.xlu0 %4, %v58_v5   ;;  %v64_v6 = vld [vmem:[#allocation0 + $0x8] sm:$0xff] }
  0x1e   :  { %65 = vperm.xlu0 %4, %v64_v6  }
  0x88   :  { %v60_v7 = vpop.permute.xlu0 %59 }
  0x89   :  { %61 = vst [vmem:[#allocation2 + $0x8] sm:$0xff] %v60_v7 }
  0x90   :  { %v70_v8 = vld [vmem:[#allocation2 + $0x8] sm:$0xf]  ;;  %v66_v9 = vpop.permute.xlu0 %65 }
  0x91   :  { %73 = vst [vmem:[#allocation3] sm:$0xf] %v70_v8 }
  0x92   :  { %67 = vst [vmem:[#allocation2] sm:$0xff] %v66_v9 }
  0x98   :  { %v96_v10 = vld [vmem:[#allocation3] sm:$0xf] }
  0x99   :  { %97 = vst [vmem:[%s153_s1] sm:$0xf] %v96_v10  ;;  %v75_v11 = vld [vmem:[#allocation2] sm:$0xf] }
  0x9a   :  { %79 = vst [vmem:[#allocation3 + $0x4] sm:$0xf] %v75_v11 }
  0xa1   :  { %v98_v12 = vld [vmem:[#allocation3 + $0x4] sm:$0xf] }
  0xa2   :  { %99 = vst [vmem:[%s153_s1 + $0x4] sm:$0xf] %v98_v12 }

// kernel: spectral_conv1d_forward.1
= control target key start
LH: loop header
LB: loop body
LE: loop exit
PB: predicated region body
PF: predicated region fallthrough
CT: control target
= control target key end

     0   :  { %s466_s18 = smov 0   ;;  %s519_s0 = inlined_call_operand.vmem [shape: f32[2,4,9], index: 0, kind: input, shape index: {}]   ;;  %s520_s1 = inlined_call_operand.vmem [shape: f32[2,4,9], index: 1, kind: input, shape index: {}]   ;;  %s521_s2 = inlined_call_operand.vmem [shape: f32[4,4,9], index: 2, kind: input, shape index: {}]   ;;  %s522_s3 = inlined_call_operand.vmem [shape: f32[4,4,9], index: 3, kind: input, shape index: {}]   ;;  %s523_s4 = inlined_call_operand.vmem [shape: f32[2,4,9], index: 4, kind: output, shape index: {0}]   ;;  %s524_s5 = inlined_call_operand.vmem [shape: f32[2,4,9], index: 5, kind: output, shape index: {1}]  }
   0x1 LB: > { %s403_s19 = sadd.s32 4294967295, %s434_s18   ;;  %p407_p0 = scmp.ge.s32.totalorder %s434_s18, 1  ;;  %s434_s18 = sphi %s466_s18, %s16_s18  }
   0x2   : > { %p198_p1 = scmp.lt.s32.totalorder %s434_s18, 3 }
   0x4   : > { %p199_p2 = pnand %p407_p0, %p198_p1 }
   0x5   : > { %p232_p3 = scmp.lt.s32.totalorder (!%p199_p2), %s403_s19, 1 }
   0x6   : > { %202 = sbr.rel (%p199_p2) target bundleno = 36 (0x24), region = 36 }
   0xb   : > { %s526_s19 = smov (!%p232_p3, %s403_s19), 1  ;;  %v250_v0 = vld [vmem:[%s521_s2] sm:$0xf]  ;;  %v412_v6 = vld [vmem:[%s521_s2 + $0x4] sm:$0xf]  ;;  %vm304_vm0 = vcmask 68608  }
   0xc   : > { %s474_s20 = sshll.u32 %s526_s19, 2  ;;  %v251_v3 = vld [vmem:[%s522_s3] sm:$0xf]  ;;  %v413_v14 = vld [vmem:[%s522_s3 + $0x4] sm:$0xf] }
   0xd   : > { %s235_s23 = scalar_lea.vmem %s519_s0, %s474_s20  ;;  %s239_s26 = scalar_lea.vmem %s520_s1, %s474_s20  ;;  %v414_v16 = vld [vmem:[%s521_s2 + $0x8] sm:$0xf]  ;;  %v416_v27 = vld [vmem:[%s521_s2 + $0xc] sm:$0xf] }
   0xe   : > { %v248_v1 = vld [vmem:[%s235_s23] sm:$0xf]  ;;  %v415_v19 = vld [vmem:[%s522_s3 + $0x8] sm:$0xf]  ;;  %v417_v32 = vld [vmem:[%s522_s3 + $0xc] sm:$0xf]  ;;  %s243_s22 = scalar_lea.vmem %s523_s4, %s474_s20  ;;  %s247_s25 = scalar_lea.vmem %s524_s5, %s474_s20 }
   0xf   : > { %v249_v2 = vld [vmem:[%s239_s26] sm:$0xf]  ;;  %v252_v4 = vperm.slane %v248_v1, 0  ;;  %v266_v7 = vperm.slane %v248_v1, 1  ;;  %v280_v9 = vperm.slane %v248_v1, 2  ;;  %v294_v26 = vperm.slane %v248_v1, 3 }
  0x10   : > { %v255_v5 = vperm.slane %v249_v2, 0  ;;  %v269_v8 = vperm.slane %v249_v2, 1  ;;  %v283_v20 = vperm.slane %v249_v2, 2  ;;  %v297_v33 = vperm.slane %v249_v2, 3 }
  0x11   : > { %v253_v10 = vmul.f32 %v252_v4, %v250_v0  ;;  %v258_v12 = vmul.f32 %v252_v4, %v251_v3  ;;  %v267_v15 = vmul.f32 %v412_v6, %v266_v7  ;;  %v272_v22 = vmul.f32 %v413_v14, %v266_v7 }
  0x12   : > { %v256_v11 = vmul.f32 %v255_v5, %v251_v3  ;;  %v260_v13 = vmul.f32 %v255_v5, %v250_v0  ;;  %v270_v18 = vmul.f32 %v413_v14, %v269_v8  ;;  %v274_v23 = vmul.f32 %v412_v6, %v269_v8 }
  0x13   : > { %v281_v25 = vmul.f32 %v414_v16, %v280_v9  ;;  %v286_v29 = vmul.f32 %v415_v19, %v280_v9  ;;  %v284_v31 = vmul.f32 %v415_v19, %v283_v20  ;;  %v288_v35 = vmul.f32 %v414_v16, %v283_v20 }
  0x14   : > { %v257_v17 = vsub.f32 %v253_v10, %v256_v11  ;;  %v261_v21 = vadd.f32 %v260_v13, %v258_v12  ;;  %v295_v37 = vmul.f32 %v416_v27, %v294_v26  ;;  %v300_v39 = vmul.f32 %v417_v32, %v294_v26 }
  0x15   : > { %v298_v41 = vmul.f32 %v417_v32, %v297_v33  ;;  %v302_v43 = vmul.f32 %v416_v27, %v297_v33 }
  0x16   : > { %v268_v24 = vadd.f32 %v267_v15, %v257_v17  ;;  %v273_v28 = vadd.f32 %v272_v22, %v261_v21 }
  0x18   : > { %v271_v30 = vsub.f32 %v268_v24, %v270_v18  ;;  %v275_v34 = vadd.f32 %v274_v23, %v273_v28 }
  0x1a   : > { %v282_v36 = vadd.f32 %v281_v25, %v271_v30  ;;  %v287_v38 = vadd.f32 %v286_v29, %v275_v34 }
  0x1c   : > { %v285_v40 = vsub.f32 %v282_v36, %v284_v31  ;;  %v289_v42 = vadd.f32 %v288_v35, %v287_v38 }
  0x1e   : > { %v296_v44 = vadd.f32 %v295_v37, %v285_v40  ;;  %v301_v45 = vadd.f32 %v300_v39, %v289_v42 }
  0x20   : > { %v299_v46 = vsub.f32 %v296_v44, %v298_v41  ;;  %v303_v47 = vadd.f32 %v302_v43, %v301_v45 }
  0x22   : > { %305 = vst.msk [vmem:[%s243_s22] sm:$0xf] %vm304_vm0, %v299_v46 }
  0x23   : > { %306 = vst.msk [vmem:[%s247_s25] sm:$0xf] %vm304_vm0, %v303_v47 }
  0x24 PF: > { %s16_s18 = sadd.s32 1, %s434_s18  }
  0x25   : > { %p13_p4 = scmp.ge.s32.totalorder %s16_s18, 4  }
  0x27   :  { %15 = sbr.rel (!%p13_p4) target bundleno = 1 (0x1), region = 87 }

</bundles_post_ra>
